<compile_context>
chip_gen: v7x
topology: tpu7x:2x2x1
jax: 0.10.0
libtpu: 0.0.40
codegen_flags: <defaults>
</compile_context>

<pallas_src>
import jax
import jax.numpy as jnp
from jax.experimental import pallas as pl
from jax.experimental.pallas import tpu as pltpu


def _mlp_kernel(x_ref, w1_ref, b1_ref, w2_ref, b2_ref, w3_ref, b3_ref, o_ref):
    # Cast x to bf16 inside the kernel (VPU, hidden under the tile DMA) so the
    # wrapper ships plain f32 and no extra XLA convert pass touches HBM.
    x = x_ref[...].astype(jnp.bfloat16)                       # (TM, 20)

    # fc1: bf16 operands on the MXU, f32 accumulation; bias/ReLU in f32.
    h1 = jnp.dot(x, w1_ref[...].astype(jnp.bfloat16),
                 preferred_element_type=jnp.float32)          # (TM, 64)
    h1 = jnp.maximum(h1 + b1_ref[...], 0.0)

    # fc2: same scheme.
    h2 = jnp.dot(h1.astype(jnp.bfloat16), w2_ref[...].astype(jnp.bfloat16),
                 preferred_element_type=jnp.float32)          # (TM, 32)
    h2 = jnp.maximum(h2 + b2_ref[...], 0.0)

    # fc3: (1, 32) contracted against (TM, 32) on the minor dim -> (1, TM).
    # bf16 operands halve the relayout / MXU weight-push bytes; the logits are
    # already lane-major so the store below is one full-width lane-dense store.
    logits = jax.lax.dot_general(
        w3_ref[...].astype(jnp.bfloat16), h2.astype(jnp.bfloat16),
        dimension_numbers=(((1,), (1,)), ((), ())),
        preferred_element_type=jnp.float32)                   # (1, TM)
    logits = logits + b3_ref[...]                             # (1, TM) + (1, 1)
    o_ref[...] = jax.nn.sigmoid(logits).astype(o_ref.dtype)


def _round_up(n, m):
    return ((n + m - 1) // m) * m


def _vmem_limit_bytes(tm):
    # Per-row VMEM footprint: double-buffered f32 x tile, bf16 x copy,
    # f32+bf16 h1 and h2 temporaries, (1, TM) logits + double-buffered output.
    per_row = (2 * 20 * 4 + 20 * 2
               + 64 * (4 + 2)
               + 32 * (4 + 2)
               + 3 * 4)
    est = tm * per_row + (2 << 20)          # + weights/biases/headroom
    # >= 32 MiB so big tiles never hit the 16/32 MiB scoped default; <= 48 MiB
    # so it stays under v7x's 64 MiB physical VMEM.
    return int(min(max(2 * est, 32 << 20), 48 << 20))


def fall_detection_forward(x, params, *, block_rows=8192):
    """x: [B, 20] float32 -> [B, 1] float32 (sigmoid probabilities)."""
    w1, b1, w2, b2, w3, b3 = params
    B, F = x.shape
    assert F == 20, "FallDetectionModel expects 20 input features"

    # Cap the tile for v7x's smaller (64 MiB) VMEM; sweepable 8K-32K elsewhere.
    block_rows = min(block_rows, 32768)
    if B <= block_rows:
        tm = _round_up(max(B, 1), 8)        # single tile, sublane-aligned
    else:
        tm = _round_up(block_rows, 128)     # keep (1, TM) out blocks lane-aligned
    num_tiles = pl.cdiv(B, tm)              # trailing partial block is masked;
                                            # garbage rows only reach discarded
                                            # output lanes (row-wise math only).

    w3_row = w3.reshape(1, -1)              # (1, 32), stays f32 at the boundary
    const = lambda i: (0, 0)                # weights/biases: DMA once, resident

    out = pl.pallas_call(
        _mlp_kernel,
        out_shape=jax.ShapeDtypeStruct((1, B), jnp.float32),
        grid=(num_tiles,),
        in_specs=[
            pl.BlockSpec((tm, 20), lambda i: (i, 0)),   # x tiles (pipelined, f32)
            pl.BlockSpec((20, 64), const),              # w1
            pl.BlockSpec((1, 64), const),               # b1
            pl.BlockSpec((64, 32), const),              # w2
            pl.BlockSpec((1, 32), const),               # b2
            pl.BlockSpec((1, 32), const),               # w3 (as a row)
            pl.BlockSpec((1, 1), const),                # b3
        ],
        out_specs=pl.BlockSpec((1, tm), lambda i: (0, i)),  # lane-dense output
        compiler_params=pltpu.CompilerParams(
            dimension_semantics=("parallel",),
            vmem_limit_bytes=_vmem_limit_bytes(tm)),
    )(x, w1, b1, w2, b2, w3_row, b3)

    # (1, B) -> (B, 1): identical element order, cheap relayout of 4*B bytes.
    return out.reshape(B, 1)


def init_params(key):
    """Deterministic init mimicking nn.Linear's uniform(-1/sqrt(fan_in), +)."""
    def linear(key, fan_in, fan_out):
        kw, kb = jax.random.split(key)
        bound = 1.0 / (fan_in ** 0.5)
        w = jax.random.uniform(kw, (fan_in, fan_out), jnp.float32, -bound, bound)
        b = jax.random.uniform(kb, (1, fan_out), jnp.float32, -bound, bound)
        return w, b

    k1, k2, k3 = jax.random.split(key, 3)
    w1, b1 = linear(k1, 20, 64)
    w2, b2 = linear(k2, 64, 32)
    w3, b3 = linear(k3, 32, 1)
    return (w1, b1, w2, b2, w3, b3)


def _reference_forward(x, params):
    """Pure-JAX reference matching the kernel's numerics (bf16 matmul operands,
    f32 accumulation; f32 bias / ReLU / sigmoid)."""
    w1, b1, w2, b2, w3, b3 = params
    h1 = jnp.dot(x.astype(jnp.bfloat16), w1.astype(jnp.bfloat16),
                 preferred_element_type=jnp.float32) + b1
    h1 = jnp.maximum(h1, 0.0)
    h2 = jnp.dot(h1.astype(jnp.bfloat16), w2.astype(jnp.bfloat16),
                 preferred_element_type=jnp.float32) + b2
    h2 = jnp.maximum(h2, 0.0)
    logits = jnp.dot(h2.astype(jnp.bfloat16), w3.astype(jnp.bfloat16),
                     preferred_element_type=jnp.float32) + b3
    return jax.nn.sigmoid(logits)


if __name__ == "__main__":
    key = jax.random.PRNGKey(0)
    kx, kp = jax.random.split(key)
    params = init_params(kp)

    # Small-batch check (single grid step, full-extent blocks).
    B = 8
    x = jax.random.normal(kx, (B, 20), dtype=jnp.float32)
    out = jax.block_until_ready(fall_detection_forward(x, params))
    ref = _reference_forward(x, params)
    assert out.shape == (B, 1)
    assert jnp.allclose(out, ref, atol=5e-3, rtol=0.0), \
        float(jnp.max(jnp.abs(out - ref)))

    # Multi-tile check exercising the cdiv grid with a masked trailing block
    # (no jnp.pad, no wrapper cast).
    B2 = 600
    x2 = jax.random.normal(kx, (B2, 20), dtype=jnp.float32)
    out2 = jax.block_until_ready(
        fall_detection_forward(x2, params, block_rows=256))
    ref2 = _reference_forward(x2, params)
    assert out2.shape == (B2, 1)
    assert jnp.allclose(out2, ref2, atol=5e-3, rtol=0.0), \
        float(jnp.max(jnp.abs(out2 - ref2)))

    print("KERNEL_OK")
</pallas_src>

<mosaic_0001>
module attributes {stable_mosaic.version = 11 : i64} {
  func.func @_mlp_kernel(%arg0: i32, %arg1: memref<8x20xf32, #tpu.memory_space<vmem>>, %arg2: memref<20x64xf32, #tpu.memory_space<vmem>>, %arg3: memref<1x64xf32, #tpu.memory_space<vmem>>, %arg4: memref<64x32xf32, #tpu.memory_space<vmem>>, %arg5: memref<1x32xf32, #tpu.memory_space<vmem>>, %arg6: memref<1x32xf32, #tpu.memory_space<vmem>>, %arg7: memref<1x1xf32, #tpu.memory_space<vmem>>, %arg8: memref<1x8xf32, #tpu.memory_space<vmem>>) attributes {dimension_semantics = [#tpu.dimension_semantics<parallel>], iteration_bounds = array<i64: 1>, scalar_prefetch = 0 : i64, scratch_operands = 0 : i64, tpu.core_type = #tpu.core_type<tc>, window_params = [{transform_indices = @transform_0, window_bounds = array<i64: 8, 20>}, {pipeline_mode = #tpu.pipeline_mode<synchronous>, transform_indices = @transform_1, window_bounds = array<i64: 20, 64>}, {pipeline_mode = #tpu.pipeline_mode<synchronous>, transform_indices = @transform_2, window_bounds = array<i64: 1, 64>}, {pipeline_mode = #tpu.pipeline_mode<synchronous>, transform_indices = @transform_3, window_bounds = array<i64: 64, 32>}, {pipeline_mode = #tpu.pipeline_mode<synchronous>, transform_indices = @transform_4, window_bounds = array<i64: 1, 32>}, {pipeline_mode = #tpu.pipeline_mode<synchronous>, transform_indices = @transform_5, window_bounds = array<i64: 1, 32>}, {pipeline_mode = #tpu.pipeline_mode<synchronous>, transform_indices = @transform_6, window_bounds = array<i64: 1, 1>}, {transform_indices = @transform_7, window_bounds = array<i64: 1, 8>}]} {
    %c0 = arith.constant 0 : index
    %c0_0 = arith.constant 0 : index
    %0 = vector.load %arg1[%c0, %c0_0] : memref<8x20xf32, #tpu.memory_space<vmem>>, vector<8x20xf32>
    %1 = arith.truncf %0 : vector<8x20xf32> to vector<8x20xbf16>
    %c0_1 = arith.constant 0 : index
    %c0_2 = arith.constant 0 : index
    %2 = vector.load %arg2[%c0_1, %c0_2] : memref<20x64xf32, #tpu.memory_space<vmem>>, vector<20x64xf32>
    %3 = arith.truncf %2 : vector<20x64xf32> to vector<20x64xbf16>
    %cst = arith.constant dense<0.000000e+00> : vector<8x64xf32>
    %4 = tpu.matmul %1, %3, %cst {dimension_numbers = #tpu.dot_dimension_numbers<[1], [0], [0], [1], [0, 0, 1, 1], [], []>} : vector<8x20xbf16>, vector<20x64xbf16>, vector<8x64xf32> -> vector<8x64xf32>
    %c0_3 = arith.constant 0 : index
    %c0_4 = arith.constant 0 : index
    %5 = vector.load %arg3[%c0_3, %c0_4] : memref<1x64xf32, #tpu.memory_space<vmem>>, vector<1x64xf32>
    %6 = vector.broadcast %5 : vector<1x64xf32> to vector<8x64xf32>
    %7 = arith.addf %4, %6 : vector<8x64xf32>
    %cst_5 = arith.constant 0.000000e+00 : f32
    %8 = vector.broadcast %cst_5 : f32 to vector<8x64xf32>
    %9 = arith.maximumf %7, %8 : vector<8x64xf32>
    %10 = arith.truncf %9 : vector<8x64xf32> to vector<8x64xbf16>
    %c0_6 = arith.constant 0 : index
    %c0_7 = arith.constant 0 : index
    %11 = vector.load %arg4[%c0_6, %c0_7] : memref<64x32xf32, #tpu.memory_space<vmem>>, vector<64x32xf32>
    %12 = arith.truncf %11 : vector<64x32xf32> to vector<64x32xbf16>
    %cst_8 = arith.constant dense<0.000000e+00> : vector<8x32xf32>
    %13 = tpu.matmul %10, %12, %cst_8 {dimension_numbers = #tpu.dot_dimension_numbers<[1], [0], [0], [1], [0, 0, 1, 1], [], []>} : vector<8x64xbf16>, vector<64x32xbf16>, vector<8x32xf32> -> vector<8x32xf32>
    %c0_9 = arith.constant 0 : index
    %c0_10 = arith.constant 0 : index
    %14 = vector.load %arg5[%c0_9, %c0_10] : memref<1x32xf32, #tpu.memory_space<vmem>>, vector<1x32xf32>
    %15 = vector.broadcast %14 : vector<1x32xf32> to vector<8x32xf32>
    %16 = arith.addf %13, %15 : vector<8x32xf32>
    %cst_11 = arith.constant 0.000000e+00 : f32
    %17 = vector.broadcast %cst_11 : f32 to vector<8x32xf32>
    %18 = arith.maximumf %16, %17 : vector<8x32xf32>
    %c0_12 = arith.constant 0 : index
    %c0_13 = arith.constant 0 : index
    %19 = vector.load %arg6[%c0_12, %c0_13] : memref<1x32xf32, #tpu.memory_space<vmem>>, vector<1x32xf32>
    %20 = arith.truncf %19 : vector<1x32xf32> to vector<1x32xbf16>
    %21 = arith.truncf %18 : vector<8x32xf32> to vector<8x32xbf16>
    %cst_14 = arith.constant dense<0.000000e+00> : vector<1x8xf32>
    %22 = tpu.matmul %20, %21, %cst_14 {dimension_numbers = #tpu.dot_dimension_numbers<[1], [1], [0], [0], [0, 0, 1, 0], [], []>} : vector<1x32xbf16>, vector<8x32xbf16>, vector<1x8xf32> -> vector<1x8xf32>
    %c0_15 = arith.constant 0 : index
    %c0_16 = arith.constant 0 : index
    %23 = vector.load %arg7[%c0_15, %c0_16] : memref<1x1xf32, #tpu.memory_space<vmem>>, vector<1x1xf32>
    %24 = vector.broadcast %23 : vector<1x1xf32> to vector<1x8xf32>
    %25 = arith.addf %22, %24 : vector<1x8xf32>
    %26 = arith.negf %25 : vector<1x8xf32>
    %27 = math.exp %26 : vector<1x8xf32>
    %cst_17 = arith.constant 1.000000e+00 : f32
    %28 = vector.broadcast %cst_17 : f32 to vector<1x8xf32>
    %29 = arith.addf %28, %27 : vector<1x8xf32>
    %30 = arith.divf %28, %29 : vector<1x8xf32>
    %c0_18 = arith.constant 0 : index
    %c0_19 = arith.constant 0 : index
    %31 = vector.load %arg8[%c0_18, %c0_19] : memref<1x8xf32, #tpu.memory_space<vmem>>, vector<1x8xf32>
    tpu.vector_store %arg8[%c0_18, %c0_19], %30 {strides = array<i32>} : memref<1x8xf32, #tpu.memory_space<vmem>>, vector<1x8xf32>,
    return
  }
  func.func @transform_0(%arg0: i32) -> (i32, i32) {
    %c0_i32 = arith.constant 0 : i32
    %c0_i32_0 = arith.constant 0 : i32
    return %arg0, %c0_i32 : i32, i32
  }
  func.func @transform_1(%arg0: i32) -> (i32, i32) {
    %c0_i32 = arith.constant 0 : i32
    %c0_i32_0 = arith.constant 0 : i32
    %c0_i32_1 = arith.constant 0 : i32
    return %c0_i32, %c0_i32_0 : i32, i32
  }
  func.func @transform_2(%arg0: i32) -> (i32, i32) {
    %c0_i32 = arith.constant 0 : i32
    %c0_i32_0 = arith.constant 0 : i32
    %c0_i32_1 = arith.constant 0 : i32
    return %c0_i32, %c0_i32_0 : i32, i32
  }
  func.func @transform_3(%arg0: i32) -> (i32, i32) {
    %c0_i32 = arith.constant 0 : i32
    %c0_i32_0 = arith.constant 0 : i32
    %c0_i32_1 = arith.constant 0 : i32
    return %c0_i32, %c0_i32_0 : i32, i32
  }
  func.func @transform_4(%arg0: i32) -> (i32, i32) {
    %c0_i32 = arith.constant 0 : i32
    %c0_i32_0 = arith.constant 0 : i32
    %c0_i32_1 = arith.constant 0 : i32
    return %c0_i32, %c0_i32_0 : i32, i32
  }
  func.func @transform_5(%arg0: i32) -> (i32, i32) {
    %c0_i32 = arith.constant 0 : i32
    %c0_i32_0 = arith.constant 0 : i32
    %c0_i32_1 = arith.constant 0 : i32
    return %c0_i32, %c0_i32_0 : i32, i32
  }
  func.func @transform_6(%arg0: i32) -> (i32, i32) {
    %c0_i32 = arith.constant 0 : i32
    %c0_i32_0 = arith.constant 0 : i32
    %c0_i32_1 = arith.constant 0 : i32
    return %c0_i32, %c0_i32_0 : i32, i32
  }
  func.func @transform_7(%arg0: i32) -> (i32, i32) {
    %c0_i32 = arith.constant 0 : i32
    %c0_i32_0 = arith.constant 0 : i32
    return %c0_i32, %arg0 : i32, i32
  }
}

</mosaic_0001>

<bundles_post_ra>
// kernel: tpu_custom_call.1
= control target key start
LH: loop header
LB: loop body
LE: loop exit
PB: predicated region body
PF: predicated region fallthrough
CT: control target
= control target key end

     0   :  { %s422_s0 = inlined_call_operand.vmem [shape: f32[8,20], index: 0, kind: input, shape index: {}]   ;;  %s423_s1 = inlined_call_operand.vmem [shape: f32[20,64], index: 1, kind: input, shape index: {}]   ;;  %s424_s2 = inlined_call_operand.vmem [shape: f32[1,64], index: 2, kind: input, shape index: {}]   ;;  %s425_s3 = inlined_call_operand.vmem [shape: f32[64,32], index: 3, kind: input, shape index: {}]   ;;  %s426_s4 = inlined_call_operand.vmem [shape: f32[1,32], index: 4, kind: input, shape index: {}]   ;;  %s427_s5 = inlined_call_operand.vmem [shape: f32[1,32], index: 5, kind: input, shape index: {}]   ;;  %s428_s6 = inlined_call_operand.<no memory space> [shape: f32[1,1], index: 6, kind: input, shape index: {}]   ;;  %s429_s7 = inlined_call_operand.hbm [shape: f32[1,8], index: 7, kind: output, shape index: {}]  }
   0x1   :  { %v12_v0 = vstv %s428_s6 }
   0x2   :  { %13 = vst [vmem:[#allocation2] sm:$0x1] %v12_v0 }
   0x3   :  { %v32_v1 = vld [vmem:[%s423_s1] sm:$0xff]  ;;  %v33_v2 = vld [vmem:[%s423_s1 + $0x8] sm:$0xff]  ;;  %v34_v3 = vld [vmem:[%s423_s1 + $0x10] sm:$0xf]  ;;  %v315_v4 = vmov 0.0   ;;  %vm48_vm0 = vcmask 1041408  }
   0x4   :  { %256 = vmatprep.subr.bf16.mxu0 %v315_v4  ;;  %v35_v5 = vpack.c.bf16 %v33_v2, %v32_v1  ;;  %v36_v6 = vpack.c.bf16 %v34_v3, %v34_v3  ;;  %264 = vmatprep.subr.bf16.mxu1 %v315_v4  ;;  %v94_v7 = vld [vmem:[%s425_s3] sm:$0xff]  ;;  %v95_v8 = vld [vmem:[%s425_s3 + $0x8] sm:$0xff]  ;;  %vm316_vm1 = vmmov 0   ;;  %v96_v10 = vld [vmem:[%s425_s3 + $0x10] sm:$0xff] }
   0x5   :  { %260 = vmatprep.mubr.msk.bf16.mxu0 %vm316_vm1, %v315_v4  ;;  %v102_v9 = vpack.c.bf16 %v95_v8, %v94_v7  ;;  %v97_v11 = vld [vmem:[%s425_s3 + $0x18] sm:$0xff]  ;;  %272 = vmatprep.mubr.msk.bf16.mxu1 %vm316_vm1, %v315_v4  ;;  %v30_v12 = vld [vmem:[%s422_s0] sm:$0xff] }
   0x6   :  { %257 = vmatpush3.bf16.msra.mxu0 %v35_v5 }
   0x7   :  { %14 = vsyncpa [#allocation4], 0  ;;  %258 = vmatprep.subr.bf16.mxu0 %v315_v4  ;;  %v50_v13 = vsel %vm48_vm0, %v36_v6, 0  ;;  %265 = vmatpush3.bf16.msra.mxu1 %v102_v9  ;;  %v103_v14 = vpack.c.bf16 %v97_v11, %v96_v10  ;;  %v31_v15 = vpack.c.bf16 %v30_v12, %v30_v12  ;;  %vm44_vm2 = vcmask 162816   ;;  %v98_v16 = vld [vmem:[%s425_s3 + $0x20] sm:$0xff]  ;;  %v99_v17 = vld [vmem:[%s425_s3 + $0x28] sm:$0xff] }
   0x8   :  { %266 = vmatprep.subr.bf16.mxu1 %v315_v4  ;;  %v104_v18 = vpack.c.bf16 %v99_v17, %v98_v16  ;;  %v100_v19 = vld [vmem:[%s425_s3 + $0x30] sm:$0xff]  ;;  %v101_v20 = vld [vmem:[%s425_s3 + $0x38] sm:$0xff]  ;;  %v240_v22 = vld [vmem:[%s424_s2] ss:$0 sm:$0xff]  ;;  %vm113_vm3 = vcmask 523264   ;;  %v317_v31 = vmov 0   ;;  %v167_v43 = vlaneseq }
   0x9   :  { %v105_v21 = vpack.c.bf16 %v101_v20, %v100_v19  ;;  %v161_v30 = vld [vmem:[#allocation2] sm:$0x1]  ;;  %286 = vset.pattern.permute.xlu0 %v317_v31  ;;  %vm171_vm4 = vcmask 261120   ;;  %vm224_vm5 = vcmask 57344  }
   0xa   :  { %259 = vmatpush3.bf16.msra.mxu0 %v50_v13  ;;  %164 = vperm.xlu0 %286, %v161_v30   ;;  %v242_v32 = vld [vmem:[%s426_s4] ss:$0 sm:$0xff]  ;;  %v168_v44 = vshrl.u32 %v167_v43, 7  ;;  %s318_s4 = smov [#allocation3]  }
   0xb   :  { %267 = vmatpush3.bf16.msra.mxu1 %v103_v14  ;;  %276 = vmatprep.subr.bf16.mxu0 %v315_v4  ;;  %v158_v41 = vld [vmem:[%s427_s5] sm:$0x1]  ;;  %s232_s28 = sshll.u32 %s318_s4, 4  ;;  %s233_s28 = int_to_ptr.vmem [resolvable:$true] %s232_s28 }
   0xc   :  { %268 = vmatprep.subr.bf16.mxu1 %v315_v4  ;;  %v159_v42 = vpack.c.bf16 %v158_v41, %v158_v41  ;;  %v169_v45 = vsub.s32 0, %v168_v44  ;;  %s291_s5 = scalar_lea.vmem %s233_s28, 16  ;;  %s295_s29 = scalar_lea.vmem %s233_s28, 32 }
   0xd   :  { %261 = vmatmul.mubr.msk.bf16.vlgmr.msra.gmra.mrb[0].mxu0 %vm44_vm2, %v31_v15  ;;  %p292_p0 = scmp.ne.s32.totalorder %s233_s28, %s291_s5  ;;  %p296_p1 = scmp.lt.s32.totalorder %s233_s28, %s233_s28 }
   0xe   :  { %278 = vmatprep.mubr.msk.bf16.mxu0 %vm316_vm1, %v315_v4  ;;  %p297_p2 = scmp.lt.s32.totalorder %s295_s29, %s291_s5 }
   0xf   :  { %269 = vmatpush3.bf16.msra.mxu1 %v104_v18 }
  0x10   :  { %270 = vmatprep.subr.bf16.mxu1 %v315_v4  ;;  %p298_p3 = por %p297_p2, %p296_p1 }
  0x12   :  { %p299_p4 = pnand %p298_p3, %p292_p0 }
  0x13   :  { %271 = vmatpush3.bf16.msra.mxu1 %v105_v21 }
  0x89   :  { %v165_v46 = vpop.permute.xlu0 %164 }
  0x8a   :  { %v170_v47 = vrot.slane %v165_v46, %v169_v45 }
  0xe0   :  { %v86_v23 = vpop.f32.mrb[0].mxu0 }
  0xe1   :  { %v87_v24 = vadd.f32 %v240_v22, %v86_v23  ;;  %v262_v25 = vpop.f32.mrb[1].mxu0 }
  0xe2   :  { %v89_v26 = vpop.f32.mrb[2].mxu0 }
  0xe3   :  { %v92_v27 = vmax.f32 %v87_v24, 0.0  ;;  %v263_v28 = vpop.f32.mrb[3].mxu0 }
  0xe5   :  { %v93_v29 = vpack.c.bf16 %v92_v27, %v92_v27 }
  0xe7   :  { %273 = vmatmul.mubr.msk.bf16.vlgmr.msra.gmra.mrb[0].mxu1 %vm113_vm3, %v93_v29 }
 0x1ba   :  { %v151_v33 = vpop.f32.mrb[0].mxu1 }
 0x1bb   :  { %v152_v34 = vadd.f32 %v242_v32, %v151_v33  ;;  %v274_v35 = vpop.f32.mrb[1].mxu1 }
 0x1bc   :  { %v154_v36 = vpop.f32.mrb[2].mxu1 }
 0x1bd   :  { %v157_v37 = vmax.f32 %v152_v34, 0.0  ;;  %v275_v38 = vpop.f32.mrb[3].mxu1 }
 0x1bf   :  { %v160_v39 = vpack.c.bf16 %v157_v37, %v157_v37 }
 0x1c1   :  { %v176_v40 = vsel %vm171_vm4, %v160_v39, 0 }
 0x1c2   :  { %277 = vmatpush3.bf16.xpose.msra.mxu0 %v176_v40 }
 0x1c9   :  { %279 = vmatmul.mubr.msk.bf16.vlgmr.msra.gmra.mrb[4].mxu0 %vm171_vm4, %v159_v42 }
 0x29c   :  { %v212_v48 = vpop.f32.mrb[4].mxu0 }
 0x29d   :  { %v213_v49 = vadd.f32 %v212_v48, %v170_v47  ;;  %v280_v50 = vpop.f32.mrb[5].mxu0 }
 0x29e   :  { %v215_v51 = vpop.f32.mrb[6].mxu0 }
 0x29f   :  { %v245_v52 = vmul.f32 -1.442695, %v213_v49  ;;  %v281_v53 = vpop.f32.mrb[7].mxu0 }
 0x2a1   :  { %287 = vpow2.f32 %v245_v52 }
 0x2ab   :  { %v288_v54 = vpop.eup %287 }
 0x2ac   :  { %v221_v55 = vadd.f32 1.0, %v288_v54 }
 0x2ae   :  { %289 = vrcp.f32 %v221_v55 }
 0x2b8   :  { %v290_v56 = vpop.eup %289 }
 0x2b9   :  { %225 = vst.msk [vmem:[#allocation3] sm:$0x1] %vm224_vm5, %v290_v56 }
 0x2ba   :  { %302 = shalt.err (!%p299_p4)
}
 0x2bb   :  { %s303_s6 = scalar_lea.hbm %s429_s7, 16 }
 0x2bc   :  { %p304_p5 = scmp.ne.s32.totalorder %s429_s7, %s303_s6  ;;  %p307_p6 = scmp.lt.u32.totalorder %s303_s6, %s429_s7 }
 0x2be   :  { %p309_p7 = pnand %p307_p6, %p304_p5 }
 0x2c0   :  { %312 = shalt.err (!%p309_p7)
}
 0x2c1   :  { %235 = dma.vmem_to_hbm [thread:$0]  %s233_s28, 16, %s429_s7, [#allocation4]  }
 0x2c2   :  { %313 = dma.done.wait [#allocation4], 16  }
 0x2c3   :  { %314 = vsyncadd [#allocation4], 4294967280 }
 0x2c4   :  { %239 = vsyncpa [#allocation4], 1 }

</bundles_post_ra>
